<compile_context>
chip_gen: v7x
topology: tpu7x:2x2x1
jax: 0.10.0
libtpu: 0.0.40
codegen_flags: <defaults>
</compile_context>

<pallas_src>
import functools
import math

import jax
import jax.numpy as jnp
from jax import lax
from jax.experimental import pallas as pl
from jax.experimental.pallas import tpu as pltpu

K = 3  # kernel_size == stride for nn.MaxPool2d(kernel_size=3)

# Finite "minus infinity", exactly representable in bf16/f32 (stays finite in
# the 0/1 picker matmul, avoiding inf * 0 -> NaN).
_LOW = float(jnp.finfo(jnp.bfloat16).min)

_TARGET_BLOCK_ELEMS = 1 << 20            # ~4 MiB f32 per input block
_VMEM_LIMIT_BYTES = 48 * 1024 * 1024     # < v7x's 64 MiB physical VMEM, with headroom
_WCHUNK_OUT = 128                        # column-pick chunk: 384 in-lanes -> 128 out-lanes


def _shift_low(arr, shift, axis):
    """`arr` shifted by `shift` toward lower indices along `axis`, filled with _LOW."""
    n = arr.shape[axis]
    if shift >= n:
        return jnp.full(arr.shape, _LOW, arr.dtype)
    sliced = lax.slice_in_dim(arr, shift, n, axis=axis)
    fill_shape = arr.shape[:axis] + (shift,) + arr.shape[axis + 1:]
    return jnp.concatenate(
        [sliced, jnp.full(fill_shape, _LOW, arr.dtype)], axis=axis)


def _make_picker(n_in, n_out):
    """(n_in, n_out) f32 matrix with P[w, j] = 1 iff w == K * j (stride-K pick)."""
    src = lax.broadcasted_iota(jnp.int32, (n_in, n_out), 0)
    dst = lax.broadcasted_iota(jnp.int32, (n_in, n_out), 1)
    return (src == dst * K).astype(jnp.float32)


def _maxpool_kernel(x_ref, pick_ref, o_ref, *, true_h, needs_mask):
    # x_ref:    (R, Hb, W)   input slab, W on the lane axis.
    # pick_ref: (wci, wco)   0/1 stride-K column picker, resident across the grid.
    # o_ref:    (R, Hob, Wo) pooled output block.
    R, Hb, W = x_ref.shape
    _, Hob, Wo = o_ref.shape

    # TODO(synk): integer inputs are routed through f32 (exact only up to 2^24);
    # fine for the float path this module is used with.

    # --- 3-tap max over rows, fused with the stride-K row pick --------------
    # tap_o[:, i, :] = x[:, K*i + o, :] via strided sublane loads straight from
    # the input block (no full-slab shift/concat pass, no second matmul later).
    taps = []
    for o in range(K):
        n_o = min(Hob, max(0, -(-(Hb - o) // K)))
        if n_o == 0:
            taps.append(jnp.full((R, Hob, W), _LOW, jnp.float32))
            continue
        r = x_ref[:, pl.ds(o, n_o, stride=K), :].astype(jnp.float32)
        if n_o < Hob:
            # ceil_mode bottom clip when the block holds the whole image height.
            r = jnp.concatenate(
                [r, jnp.full((R, Hob - n_o, W), _LOW, jnp.float32)], axis=1)
        if needs_mask and o > 0:
            # Last H block can overrun the true image height: garbage -> _LOW.
            h_start = pl.program_id(1) * Hb
            row = (lax.broadcasted_iota(jnp.int32, (1, Hob, 1), 1) * K
                   + (h_start + o))
            r = jnp.where(row < true_h, r, _LOW)
        taps.append(r)
    hrows = jnp.maximum(taps[0], jnp.maximum(taps[1], taps[2]))  # (R, Hob, W)

    # --- 3-tap max over columns (lane shifts; _LOW fill = ceil right clip) ---
    wmax = jnp.maximum(
        hrows, jnp.maximum(_shift_low(hrows, 1, 2), _shift_low(hrows, 2, 2)))

    # --- stride-K column pick: exact 0/1 matmuls, block-diagonal in chunks ---
    hob8 = Hob if Hob % 8 == 0 else (-(-Hob // 8)) * 8
    if hob8 != Hob:  # keep the (R, Hob) -> (R*Hob,) merge sublane-tile aligned
        wmax = jnp.concatenate(
            [wmax, jnp.full((R, hob8 - Hob, W), _LOW, jnp.float32)], axis=1)
    flat = wmax.reshape(R * hob8, W)

    hp = lax.Precision.HIGHEST  # exact f32 passthrough -- do not lower this
    n_chunks = -(-Wo // _WCHUNK_OUT)
    for j in range(n_chunks):
        wo0 = j * _WCHUNK_OUT
        wo1 = min(Wo, wo0 + _WCHUNK_OUT)
        wi0 = K * wo0
        wi1 = min(W, wi0 + K * (wo1 - wo0))
        res = jnp.dot(flat[:, wi0:wi1], pick_ref[:wi1 - wi0, :wo1 - wo0],
                      preferred_element_type=jnp.float32, precision=hp)
        out = res.reshape(R, hob8, wo1 - wo0)[:, :Hob, :].astype(o_ref.dtype)
        if n_chunks == 1:
            o_ref[...] = out
        else:
            o_ref[:, :, wo0:wo1] = out


@jax.jit
def maxpool2d_k3_ceil(x):
    """nn.MaxPool2d(kernel_size=3, ceil_mode=True) on an NCHW tensor."""
    N, C, H, W = x.shape
    Ho = -(-H // K)
    Wo = -(-W // K)
    NC = N * C
    xr = x.reshape(NC, H, W)  # metadata-only reshape, no HBM traffic

    spatial = H * W
    rows_out_fit = max(1, (_TARGET_BLOCK_ELEMS // max(1, W)) // K)
    if spatial <= _TARGET_BLOCK_ELEMS or rows_out_fit >= Ho or Ho <= 8:
        # Whole spatial slab per grid step; tile only N*C.
        R = max(1, min(NC, _TARGET_BLOCK_ELEMS // max(1, spatial)))
        if NC >= 2 and NC * spatial >= (1 << 19):
            R = min(R, -(-NC // 2))  # keep >=2 steps so both v7x TCs get work
        Hb, Hob, num_h = H, Ho, 1
    else:
        # Large images: one channel per step, tile H in multiples of 8 out-rows
        # (input H tile = 3x that, so block indices line up exactly).
        R = 1
        Hob = max(8, (min(rows_out_fit, Ho) // 8) * 8)
        Hb = K * Hob
        num_h = -(-Ho // Hob)
    num_nc = -(-NC // R)
    needs_mask = num_h * Hb > H  # last H block overruns the true image height

    # Canonical per-chunk column picker, hoisted out of the kernel body and
    # kept resident in VMEM for the whole grid.
    wco = min(_WCHUNK_OUT, Wo)
    wci = min(W, K * wco)
    pick = _make_picker(wci, wco)

    kernel = functools.partial(_maxpool_kernel, true_h=H, needs_mask=needs_mask)
    out = pl.pallas_call(
        kernel,
        out_shape=jax.ShapeDtypeStruct((NC, Ho, Wo), x.dtype),
        grid=(num_nc, num_h),
        in_specs=[
            pl.BlockSpec((R, Hb, W), lambda r, h: (r, h, 0)),
            pl.BlockSpec((wci, wco), lambda r, h: (0, 0)),
        ],
        out_specs=pl.BlockSpec((R, Hob, Wo), lambda r, h: (r, h, 0)),
        compiler_params=pltpu.CompilerParams(
            dimension_semantics=("parallel", "parallel"),
            vmem_limit_bytes=_VMEM_LIMIT_BYTES),
    )(xr, pick)
    return out.reshape(N, C, Ho, Wo)


class Tudui:
    """JAX/Pallas equivalent of the PyTorch Tudui module (no parameters)."""

    def __call__(self, x):
        return maxpool2d_k3_ceil(x)


def _reference_maxpool(x):
    # Pure-JAX reference (float inputs): pad clipped windows with -inf.
    N, C, H, W = x.shape
    Ho, Wo = math.ceil(H / K), math.ceil(W / K)
    xp = jnp.pad(
        x, ((0, 0), (0, 0), (0, Ho * K - H), (0, Wo * K - W)),
        constant_values=-jnp.inf)
    return jnp.max(xp.reshape(N, C, Ho, K, Wo, K), axis=(3, 5))


if __name__ == "__main__":
    key = jax.random.PRNGKey(0)
    # Small NCHW input: batch=2, channels=4, spatial=16x16 -> output 2x4x6x6.
    x = jax.random.normal(key, (2, 4, 16, 16), dtype=jnp.float32)

    model = Tudui()
    out = jax.block_until_ready(model(x))

    ref = _reference_maxpool(x)
    assert out.shape == (2, 4, 6, 6), out.shape
    assert out.dtype == x.dtype, out.dtype
    assert jnp.allclose(out, ref, rtol=1e-5, atol=1e-5), float(
        jnp.max(jnp.abs(out - ref)))

    print("KERNEL_OK")
</pallas_src>

<mosaic_0001>
module attributes {stable_mosaic.version = 11 : i64} {
  func.func @_maxpool_kernel(%arg0: i32, %arg1: i32, %arg2: memref<8x16x16xf32, #tpu.memory_space<vmem>>, %arg3: memref<16x6xf32, #tpu.memory_space<vmem>>, %arg4: memref<8x6x6xf32, #tpu.memory_space<vmem>>) attributes {dimension_semantics = [#tpu.dimension_semantics<parallel>, #tpu.dimension_semantics<parallel>], iteration_bounds = array<i64: 1, 1>, scalar_prefetch = 0 : i64, scratch_operands = 0 : i64, tpu.core_type = #tpu.core_type<tc>, window_params = [{transform_indices = @transform_0, window_bounds = array<i64: 8, 16, 16>}, {pipeline_mode = #tpu.pipeline_mode<synchronous>, transform_indices = @transform_1, window_bounds = array<i64: 16, 6>}, {transform_indices = @transform_2, window_bounds = array<i64: 8, 6, 6>}]} {
    %c0 = arith.constant 0 : index
    %c0_0 = arith.constant 0 : index
    %c0_1 = arith.constant 0 : index
    %0 = tpu.strided_load %arg2[%c0, %c0_0, %c0_1] {strides = array<i32: 1, 3, 1>} : memref<8x16x16xf32, #tpu.memory_space<vmem>>, vector<8x6x16xf32>
    %c0_2 = arith.constant 0 : index
    %c1 = arith.constant 1 : index
    %c0_3 = arith.constant 0 : index
    %1 = tpu.strided_load %arg2[%c0_2, %c1, %c0_3] {strides = array<i32: 1, 3, 1>} : memref<8x16x16xf32, #tpu.memory_space<vmem>>, vector<8x5x16xf32>
    %cst = arith.constant -3.38953139E+38 : f32
    %2 = vector.broadcast %cst : f32 to vector<8x1x16xf32>
    %3 = tpu.concatenate %1, %2 in 1 : vector<8x5x16xf32>, vector<8x1x16xf32> -> vector<8x6x16xf32>
    %c0_4 = arith.constant 0 : index
    %c2 = arith.constant 2 : index
    %c0_5 = arith.constant 0 : index
    %4 = tpu.strided_load %arg2[%c0_4, %c2, %c0_5] {strides = array<i32: 1, 3, 1>} : memref<8x16x16xf32, #tpu.memory_space<vmem>>, vector<8x5x16xf32>
    %cst_6 = arith.constant -3.38953139E+38 : f32
    %5 = vector.broadcast %cst_6 : f32 to vector<8x1x16xf32>
    %6 = tpu.concatenate %4, %5 in 1 : vector<8x5x16xf32>, vector<8x1x16xf32> -> vector<8x6x16xf32>
    %7 = arith.maximumf %3, %6 : vector<8x6x16xf32>
    %8 = arith.maximumf %0, %7 : vector<8x6x16xf32>
    %9 = vector.extract_strided_slice %8 {offsets = [0, 0, 1], sizes = [8, 6, 15], strides = [1, 1, 1]} : vector<8x6x16xf32> to vector<8x6x15xf32>
    %cst_7 = arith.constant -3.38953139E+38 : f32
    %10 = vector.broadcast %cst_7 : f32 to vector<8x6x1xf32>
    %11 = tpu.concatenate %9, %10 in 2 : vector<8x6x15xf32>, vector<8x6x1xf32> -> vector<8x6x16xf32>
    %12 = vector.extract_strided_slice %8 {offsets = [0, 0, 2], sizes = [8, 6, 14], strides = [1, 1, 1]} : vector<8x6x16xf32> to vector<8x6x14xf32>
    %cst_8 = arith.constant -3.38953139E+38 : f32
    %13 = vector.broadcast %cst_8 : f32 to vector<8x6x2xf32>
    %14 = tpu.concatenate %12, %13 in 2 : vector<8x6x14xf32>, vector<8x6x2xf32> -> vector<8x6x16xf32>
    %15 = arith.maximumf %11, %14 : vector<8x6x16xf32>
    %16 = arith.maximumf %8, %15 : vector<8x6x16xf32>
    %cst_9 = arith.constant -3.38953139E+38 : f32
    %17 = vector.broadcast %cst_9 : f32 to vector<8x2x16xf32>
    %18 = tpu.concatenate %16, %17 in 1 : vector<8x6x16xf32>, vector<8x2x16xf32> -> vector<8x8x16xf32>
    %19 = vector.shape_cast %18 : vector<8x8x16xf32> to vector<64x16xf32>
    %c0_10 = arith.constant 0 : index
    %c0_11 = arith.constant 0 : index
    %20 = vector.load %arg3[%c0_10, %c0_11] : memref<16x6xf32, #tpu.memory_space<vmem>>, vector<16x6xf32>
    %cst_12 = arith.constant dense<0.000000e+00> : vector<64x6xf32>
    %21 = tpu.matmul %19, %20, %cst_12 {dimension_numbers = #tpu.dot_dimension_numbers<[1], [0], [0], [1], [0, 0, 1, 1], [], []>, precision = #tpu.contract_precision<fp32>} : vector<64x16xf32>, vector<16x6xf32>, vector<64x6xf32> -> vector<64x6xf32>
    %22 = vector.shape_cast %21 : vector<64x6xf32> to vector<8x8x6xf32>
    %23 = vector.extract_strided_slice %22 {offsets = [0, 0, 0], sizes = [8, 6, 6], strides = [1, 1, 1]} : vector<8x8x6xf32> to vector<8x6x6xf32>
    %c0_13 = arith.constant 0 : index
    %c0_14 = arith.constant 0 : index
    %c0_15 = arith.constant 0 : index
    %24 = vector.load %arg4[%c0_13, %c0_14, %c0_15] : memref<8x6x6xf32, #tpu.memory_space<vmem>>, vector<8x6x6xf32>
    tpu.vector_store %arg4[%c0_13, %c0_14, %c0_15], %23 {strides = array<i32>} : memref<8x6x6xf32, #tpu.memory_space<vmem>>, vector<8x6x6xf32>,
    return
  }
  func.func @transform_0(%arg0: i32, %arg1: i32) -> (i32, i32, i32) {
    %c0_i32 = arith.constant 0 : i32
    %c0_i32_0 = arith.constant 0 : i32
    return %arg0, %arg1, %c0_i32 : i32, i32, i32
  }
  func.func @transform_1(%arg0: i32, %arg1: i32) -> (i32, i32) {
    %c0_i32 = arith.constant 0 : i32
    %c0_i32_0 = arith.constant 0 : i32
    %c0_i32_1 = arith.constant 0 : i32
    return %c0_i32, %c0_i32_0 : i32, i32
  }
  func.func @transform_2(%arg0: i32, %arg1: i32) -> (i32, i32, i32) {
    %c0_i32 = arith.constant 0 : i32
    %c0_i32_0 = arith.constant 0 : i32
    return %arg0, %arg1, %c0_i32 : i32, i32, i32
  }
}

</mosaic_0001>

<bundles_post_ra>
// kernel: maxpool2d_k3_ceil.1
= control target key start
LH: loop header
LB: loop body
LE: loop exit
PB: predicated region body
PF: predicated region fallthrough
CT: control target
= control target key end

     0   :  { %7 = vsyncpa [#allocation3], 0  ;;  %s1254_s9 = smov [#allocation2]   ;;  %s1513_s0 = inlined_call_operand.hbm [shape: f32[8,16,16], index: 0, kind: input, shape index: {}]   ;;  %s1514_s1 = inlined_call_operand.vmem [shape: f32[16,6], index: 1, kind: input, shape index: {}]   ;;  %s1515_s2 = inlined_call_operand.vmem [shape: f32[8,6,6], index: 2, kind: output, shape index: {}]  }
   0x1   :  { %s13_s10 = sshll.u32 %s1254_s9, 4  ;;  %s1230_s13 = scalar_lea.hbm %s1513_s0, 2048  ;;  %s14_s10 = int_to_ptr.vmem [resolvable:$true] %s13_s10 }
   0x2   :  { %p1231_p0 = scmp.ne.s32.totalorder %s1513_s0, %s1230_s13  ;;  %p1234_p1 = scmp.lt.u32.totalorder %s1230_s13, %s1513_s0 }
   0x4   :  { %p1236_p2 = pnand %p1234_p1, %p1231_p0 }
   0x6   :  { %1239 = shalt.err (!%p1236_p2)
}
   0x7   :  { %s1240_s18 = scalar_lea.vmem %s14_s10, 2048  ;;  %p1245_p4 = scmp.lt.s32.totalorder %s14_s10, %s14_s10 }
   0x8   :  { %p1241_p3 = scmp.ne.s32.totalorder %s14_s10, %s1240_s18  ;;  %p1246_p5 = scmp.lt.s32.totalorder %s1240_s18, %s1240_s18 }
   0xa   :  { %p1247_p6 = por %p1246_p5, %p1245_p4 }
   0xc   :  { %p1248_p7 = pnand %p1247_p6, %p1241_p3 }
   0xe   :  { %1251 = shalt.err (!%p1248_p7)
}
   0xf   :  { %s1255_s19 = smov 128   ;;  %s1256_s20 = smov 8  }
  0x10   :  { %19 = dma.hbm_to_vmem [thread:$0]  %s1513_s0, 2048, %s14_s10, [#allocation3], %s1255_s19, %s1255_s19, %s1256_s20  }
  0x11   :  { %1252 = dma.done.wait [#allocation3], 2048  }
  0x12   :  { %1253 = vsyncadd [#allocation3], 4294965248  ;;  %vm56_vm0 = vcmask 1044480   ;;  %v43_v0 = vld [vmem:[#allocation2 + $0x11] ss:$3 sm:$0x1f] }
  0x13   :  { %v58_v1 = vsel %vm56_vm0, %v43_v0, -3.3895314e+38  ;;  %v68_v2 = vld [vmem:[#allocation2 + $0x12] ss:$3 sm:$0x1f]  ;;  %v1297_v17 = vld [vmem:[%s1514_s1] sm:$0xff]  ;;  %s1257_s24 = smov 127  }
  0x14   :  { %v27_v3 = vld [vmem:[#allocation2 + $0x10] ss:$3 sm:$0x3f]  ;;  %v82_v4 = vsel %vm56_vm0, %v68_v2, -3.3895314e+38  ;;  %v205_v25 = vld [vmem:[%s1514_s1 + $0x8] sm:$0xff]  ;;  %v232_v28 = vand.u32 4294901760, %v1297_v17 }
  0x15   :  { %v90_v5 = vmax.f32 %v58_v1, %v82_v4  ;;  %v41_v6 = vld [vmem:[#allocation2 + $0x1] ss:$3 sm:$0x1f]  ;;  %v66_v7 = vld [vmem:[#allocation2 + $0x2] ss:$3 sm:$0x1f] }
  0x16   :  { %v25_v8 = vld [vmem:[#allocation2] ss:$3 sm:$0x3f]  ;;  %v57_v9 = vsel %vm56_vm0, %v41_v6, -3.3895314e+38  ;;  %v81_v10 = vsel %vm56_vm0, %v66_v7, -3.3895314e+38  ;;  %s1258_s27 = smov 126   ;;  %v380_v61 = vsub.f32 %v1297_v17, %v232_v28 }
  0x17   :  { %v1290_v11 = vmax.f32 %v27_v3, %v90_v5  ;;  %v89_v12 = vmax.f32 %v57_v9, %v81_v10  ;;  %v45_v13 = vld [vmem:[#allocation2 + $0x21] ss:$3 sm:$0x1f]  ;;  %v70_v14 = vld [vmem:[#allocation2 + $0x22] ss:$3 sm:$0x1f] }
  0x18   :  { %v59_v15 = vsel %vm56_vm0, %v45_v13, -3.3895314e+38  ;;  %v83_v16 = vsel %vm56_vm0, %v70_v14, -3.3895314e+38  ;;  %v47_v20 = vld [vmem:[#allocation2 + $0x31] ss:$3 sm:$0x1f]  ;;  %v235_v34 = vand.u32 4294901760, %v205_v25 }
  0x19   :  { %115 = vrot.lane.b32.xlu1 %v1290_v11, %s1257_s24  ;;  %v1301_v18 = vmax.f32 %v25_v8, %v89_v12  ;;  %v91_v19 = vmax.f32 %v59_v15, %v83_v16  ;;  %v72_v21 = vld [vmem:[#allocation2 + $0x32] ss:$3 sm:$0x1f]  ;;  %v29_v22 = vld [vmem:[#allocation2 + $0x20] ss:$3 sm:$0x3f] }
  0x1a   :  { %v60_v23 = vsel %vm56_vm0, %v47_v20, -3.3895314e+38  ;;  %v84_v24 = vsel %vm56_vm0, %v72_v21, -3.3895314e+38  ;;  %v49_v26 = vld [vmem:[#allocation2 + $0x41] ss:$3 sm:$0x1f]  ;;  %v1319_v37 = vpack.c.bf16 %v235_v34, %v232_v28  ;;  %v387_v62 = vsub.f32 %v205_v25, %v235_v34 }
  0x1b   :  { %113 = vrot.lane.b32.xlu0 %v1301_v18, %s1257_s24  ;;  %v74_v27 = vld [vmem:[#allocation2 + $0x42] ss:$3 sm:$0x1f]  ;;  %v1313_v29 = vmax.f32 %v29_v22, %v91_v19  ;;  %v92_v30 = vmax.f32 %v60_v23, %v84_v24  ;;  %v31_v31 = vld [vmem:[#allocation2 + $0x30] ss:$3 sm:$0x3f] }
  0x1c   :  { %v61_v32 = vsel %vm56_vm0, %v49_v26, -3.3895314e+38  ;;  %v85_v33 = vsel %vm56_vm0, %v74_v27, -3.3895314e+38  ;;  %v51_v35 = vld [vmem:[#allocation2 + $0x51] ss:$3 sm:$0x1f]  ;;  %1174 = vmatprep.subr.bf16.mxu0 %v1319_v37  ;;  %1162 = vmatprep.subr.bf16.mxu1 %v1319_v37  ;;  %v381_v63 = vand.u32 4294901760, %v380_v61  ;;  %v1372_v7 = vpack.c.bf16 %v387_v62, %v380_v61 }
  0x1d   :  { %148 = vrot.lane.b32.xlu1 %v1290_v11, %s1258_s27  ;;  %v76_v36 = vld [vmem:[#allocation2 + $0x52] ss:$3 sm:$0x1f]  ;;  %v1323_v38 = vmax.f32 %v31_v31, %v92_v30  ;;  %v93_v39 = vmax.f32 %v61_v32, %v85_v33  ;;  %v33_v40 = vld [vmem:[#allocation2 + $0x40] ss:$3 sm:$0x3f]  ;;  %1176 = vmatpush3.bf16.msra.mxu0 %v1319_v37 }
  0x1e   :  { %v62_v41 = vsel %vm56_vm0, %v51_v35, -3.3895314e+38  ;;  %v86_v42 = vsel %vm56_vm0, %v76_v36, -3.3895314e+38  ;;  %v53_v43 = vld [vmem:[#allocation2 + $0x61] ss:$3 sm:$0x1f]  ;;  %1164 = vmatpush3.bf16.msra.mxu1 %v1319_v37  ;;  %v388_v0 = vand.u32 4294901760, %v387_v62  ;;  %v382_v1 = vsub.f32 %v380_v61, %v381_v63 }
  0x1f   :  { %146 = vrot.lane.b32.xlu0 %v1301_v18, %s1258_s27  ;;  %v78_v44 = vld [vmem:[#allocation2 + $0x62] ss:$3 sm:$0x1f]  ;;  %v1335_v45 = vmax.f32 %v33_v40, %v93_v39  ;;  %v94_v46 = vmax.f32 %v62_v41, %v86_v42  ;;  %v35_v47 = vld [vmem:[#allocation2 + $0x50] ss:$3 sm:$0x3f] }
  0x20   :  { %v63_v48 = vsel %vm56_vm0, %v53_v43, -3.3895314e+38  ;;  %v87_v49 = vsel %vm56_vm0, %v78_v44, -3.3895314e+38  ;;  %v55_v50 = vld [vmem:[#allocation2 + $0x71] ss:$3 sm:$0x1f]  ;;  %v389_v2 = vsub.f32 %v387_v62, %v388_v0  ;;  %v1364_v3 = vpack.c.bf16 %v388_v0, %v381_v63 }
  0x21   :  { %150 = vrot.lane.b32.xlu1 %v1313_v29, %s1258_s27  ;;  %v80_v51 = vld [vmem:[#allocation2 + $0x72] ss:$3 sm:$0x1f]  ;;  %v1343_v52 = vmax.f32 %v35_v47, %v94_v46  ;;  %v95_v53 = vmax.f32 %v63_v48, %v87_v49  ;;  %v37_v54 = vld [vmem:[#allocation2 + $0x60] ss:$3 sm:$0x3f] }
  0x22   :  { %v64_v55 = vsel %vm56_vm0, %v55_v50, -3.3895314e+38  ;;  %v88_v56 = vsel %vm56_vm0, %v80_v51, -3.3895314e+38  ;;  %v39_v59 = vld [vmem:[#allocation2 + $0x70] ss:$3 sm:$0x3f]  ;;  %v383_v4 = vand.u32 4294901760, %v382_v1  ;;  %1178 = vmatprep.subr.bf16.mxu0 %v1364_v3 }
  0x23   :  { %117 = vrot.lane.b32.xlu0 %v1313_v29, %s1257_s24  ;;  %v1351_v57 = vmax.f32 %v37_v54, %v95_v53  ;;  %v96_v58 = vmax.f32 %v64_v55, %v88_v56  ;;  %v390_v5 = vand.u32 4294901760, %v389_v2  ;;  %vm137_vm1 = vcmask 121856  }
  0x24   :  { %vm170_vm2 = vcmask 113664   ;;  %vm195_vm3 = vcmask 1045504   ;;  %vm206_vm4 = vcmask 130048   ;;  %vm991_vm5 = vcmask 46080  }
  0x25   :  { %152 = vrot.lane.b32.xlu1 %v1323_v38, %s1258_s27  ;;  %v1357_v60 = vmax.f32 %v39_v59, %v96_v58  ;;  %v1369_v6 = vpack.c.bf16 %v390_v5, %v383_v4 }
  0x27   :  { %119 = vrot.lane.b32.xlu0 %v1323_v38, %s1257_s24  ;;  %1166 = vmatprep.subr.bf16.mxu1 %v1369_v6 }
  0x29   :  { %154 = vrot.lane.b32.xlu1 %v1335_v45, %s1258_s27 }
  0x2b   :  { %121 = vrot.lane.b32.xlu0 %v1335_v45, %s1257_s24 }
  0x2d   :  { %156 = vrot.lane.b32.xlu1 %v1343_v52, %s1258_s27 }
  0x2f   :  { %123 = vrot.lane.b32.xlu0 %v1343_v52, %s1257_s24 }
  0x31   :  { %158 = vrot.lane.b32.xlu1 %v1351_v57, %s1258_s27 }
  0x33   :  { %125 = vrot.lane.b32.xlu0 %v1351_v57, %s1257_s24 }
  0x35   :  { %160 = vrot.lane.b32.xlu1 %v1357_v60, %s1258_s27 }
  0x37   :  { %127 = vrot.lane.b32.xlu0 %v1357_v60, %s1257_s24 }
  0x8b   :  { %v116_v8 = vpop.permute.xlu1 %115 }
  0x8c   :  { %v139_v12 = vsel %vm137_vm1, %v116_v8, -3.3895314e+38 }
  0x8d   :  { %v114_v9 = vpop.permute.xlu0 %113 }
  0x8e   :  { %v138_v16 = vsel %vm137_vm1, %v114_v9, -3.3895314e+38 }
  0x8f   :  { %v149_v10 = vpop.permute.xlu1 %148 }
  0x90   :  { %v172_v13 = vsel %vm170_vm2, %v149_v10, -3.3895314e+38 }
  0x91   :  { %v180_v14 = vmax.f32 %v139_v12, %v172_v13  ;;  %v147_v15 = vpop.permute.xlu0 %146 }
  0x92   :  { %v171_v17 = vsel %vm170_vm2, %v147_v15, -3.3895314e+38 }
  0x93   :  { %v188_v19 = vmax.f32 %v1290_v11, %v180_v14  ;;  %v179_v20 = vmax.f32 %v138_v16, %v171_v17  ;;  %v151_v21 = vpop.permute.xlu1 %150 }
  0x94   :  { %v173_v22 = vsel %vm170_vm2, %v151_v21, -3.3895314e+38 }
  0x95   :  { %v197_v23 = vsel %vm195_vm3, %v188_v19, -3.3895314e+38  ;;  %v187_v24 = vmax.f32 %v1301_v18, %v179_v20  ;;  %v118_v25 = vpop.permute.xlu0 %117 }
  0x96   :  { %v211_v26 = vsel %vm206_vm4, %v197_v23, 0  ;;  %v140_v27 = vsel %vm137_vm1, %v118_v25, -3.3895314e+38 }
  0x97   :  { %v1384_v28 = vand.u32 4294901760, %v211_v26  ;;  %v196_v30 = vsel %vm195_vm3, %v187_v24, -3.3895314e+38  ;;  %v181_v31 = vmax.f32 %v140_v27, %v173_v22  ;;  %v153_v32 = vpop.permute.xlu1 %152 }
  0x98   :  { %v208_v11 = vsel %vm206_vm4, %v196_v30, 0  ;;  %v174_v33 = vsel %vm170_vm2, %v153_v32, -3.3895314e+38 }
  0x99   :  { %v1390_v34 = vsub.f32 %v211_v26, %v1384_v28  ;;  %v1392_v35 = vand.u32 4294901760, %v208_v11  ;;  %v189_v18 = vmax.f32 %v1313_v29, %v181_v31  ;;  %v120_v36 = vpop.permute.xlu0 %119 }
  0x9a   :  { %v141_v39 = vsel %vm137_vm1, %v120_v36, -3.3895314e+38 }
  0x9b   :  { %v198_v40 = vsel %vm195_vm3, %v189_v18, -3.3895314e+38  ;;  %v182_v41 = vmax.f32 %v141_v39, %v174_v33  ;;  %v155_v42 = vpop.permute.xlu1 %154  ;;  %v1398_v43 = vsub.f32 %v208_v11, %v1392_v35  ;;  %v310_v44 = vand.u32 4294901760, %v1390_v34 }
  0x9c   :  { %v214_v46 = vsel %vm206_vm4, %v198_v40, 0  ;;  %v175_v47 = vsel %vm170_vm2, %v155_v42, -3.3895314e+38 }
  0x9d   :  { %v1403_v48 = vand.u32 4294901760, %v214_v46  ;;  %v190_v29 = vmax.f32 %v1323_v38, %v182_v41  ;;  %v122_v49 = vpop.permute.xlu0 %121  ;;  %v300_v50 = vand.u32 4294901760, %v1398_v43  ;;  %v311_v51 = vsub.f32 %v1390_v34, %v310_v44 }
  0x9e   :  { %v142_v53 = vsel %vm137_vm1, %v122_v49, -3.3895314e+38 }
  0x9f   :  { %v1410_v54 = vsub.f32 %v214_v46, %v1403_v48  ;;  %v199_v55 = vsel %vm195_vm3, %v190_v29, -3.3895314e+38  ;;  %v183_v56 = vmax.f32 %v142_v53, %v175_v47  ;;  %1117 = vmatprep.mubr.f32.mxu0 %v300_v50  ;;  %v157_v58 = vpop.permute.xlu1 %156  ;;  %v301_v59 = vsub.f32 %v1398_v43, %v300_v50 }
  0xa0   :  { %v217_v61 = vsel %vm206_vm4, %v199_v55, 0  ;;  %1118 = vmatmul.mubr.f32.vlgmr.msra.gmra.mrb[0].mxu0 %v310_v44  ;;  %v176_v38 = vsel %vm170_vm2, %v157_v58, -3.3895314e+38  ;;  %v312_v62 = vand.u32 4294901760, %v311_v51 }
  0xa1   :  { %v1416_v63 = vand.u32 4294901760, %v217_v61  ;;  %v191_v0 = vmax.f32 %v1335_v45, %v183_v56  ;;  %v124_v1 = vpop.permute.xlu0 %123  ;;  %v302_v2 = vand.u32 4294901760, %v301_v59  ;;  %v320_v4 = vand.u32 4294901760, %v1410_v54  ;;  %1180 = vmatpush3.bf16.msra.mxu0 %v1364_v3 }
  0xa2   :  { %v143_v5 = vsel %vm137_vm1, %v124_v1, -3.3895314e+38  ;;  %1182 = vmatprep.subr.bf16.mxu0 %v1319_v37 }
  0xa3   :  { %v1424_v8 = vsub.f32 %v217_v61, %v1416_v63  ;;  %v200_v9 = vsel %vm195_vm3, %v191_v0, -3.3895314e+38  ;;  %v184_v10 = vmax.f32 %v143_v5, %v176_v38  ;;  %1069 = vmatprep.mubr.f32.mxu1 %v302_v2  ;;  %1120 = vmatprep.mubr.f32.mxu0 %v320_v4  ;;  %v159_v12 = vpop.permute.xlu1 %158  ;;  %v321_v45 = vsub.f32 %v1410_v54, %v320_v4 }
  0xa4   :  { %v220_v13 = vsel %vm206_vm4, %v200_v9, 0  ;;  %1070 = vmatmul.mubr.f32.vlgmr.msra.gmra.mrb[0].mxu1 %v312_v62  ;;  %v177_v3 = vsel %vm170_vm2, %v159_v12, -3.3895314e+38 }
  0xa5   :  { %v1430_v14 = vand.u32 4294901760, %v220_v13  ;;  %v192_v15 = vmax.f32 %v1343_v52, %v184_v10  ;;  %v126_v16 = vpop.permute.xlu0 %125  ;;  %v322_v17 = vand.u32 4294901760, %v321_v45  ;;  %v330_v19 = vand.u32 4294901760, %v1424_v8  ;;  %1168 = vmatpush3.bf16.msra.mxu1 %v1369_v6 }
  0xa6   :  { %v144_v20 = vsel %vm137_vm1, %v126_v16, -3.3895314e+38  ;;  %1170 = vmatprep.subr.bf16.mxu1 %v1372_v7 }
  0xa7   :  { %v1438_v21 = vsub.f32 %v220_v13, %v1430_v14  ;;  %v201_v22 = vsel %vm195_vm3, %v192_v15, -3.3895314e+38  ;;  %v185_v23 = vmax.f32 %v144_v20, %v177_v3  ;;  %1072 = vmatprep.mubr.f32.mxu1 %v322_v17  ;;  %1121 = vmatmul.mubr.f32.gmra.mrb[2].mxu0 %v330_v19  ;;  %v161_v24 = vpop.permute.xlu1 %160  ;;  %v331_v52 = vsub.f32 %v1424_v8, %v330_v19 }
  0xa8   :  { %v223_v25 = vsel %vm206_vm4, %v201_v22, 0  ;;  %v178_v26 = vsel %vm170_vm2, %v161_v24, -3.3895314e+38 }
  0xa9   :  { %v1444_v6 = vand.u32 4294901760, %v223_v25  ;;  %v193_v27 = vmax.f32 %v1351_v57, %v185_v23  ;;  %v128_v30 = vpop.permute.xlu0 %127  ;;  %v332_v31 = vand.u32 4294901760, %v331_v52  ;;  %v340_v32 = vand.u32 4294901760, %v1438_v21 }
  0xaa   :  { %v145_v11 = vsel %vm137_vm1, %v128_v30, -3.3895314e+38 }
  0xab   :  { %v349_v33 = vsub.f32 %v223_v25, %v1444_v6  ;;  %v202_v18 = vsel %vm195_vm3, %v193_v27, -3.3895314e+38  ;;  %v186_v36 = vmax.f32 %v145_v11, %v178_v26  ;;  %1073 = vmatmul.mubr.f32.gmra.mrb[2].mxu1 %v332_v31  ;;  %1123 = vmatprep.mubr.f32.mxu0 %v340_v32  ;;  %v341_v39 = vsub.f32 %v1438_v21, %v340_v32 }
  0xac   :  { %v226_v40 = vsel %vm206_vm4, %v202_v18, 0 }
  0xad   :  { %v358_v41 = vand.u32 4294901760, %v226_v40  ;;  %v194_v57 = vmax.f32 %v1357_v60, %v186_v36  ;;  %v342_v42 = vand.u32 4294901760, %v341_v39  ;;  %v350_v44 = vand.u32 4294901760, %v349_v33 }
  0xaf   :  { %v359_v46 = vsub.f32 %v226_v40, %v358_v41  ;;  %v203_v47 = vsel %vm195_vm3, %v194_v57, -3.3895314e+38  ;;  %1075 = vmatprep.mubr.f32.mxu1 %v342_v42  ;;  %1124 = vmatmul.mubr.f32.gmra.mrb[4].mxu0 %v350_v44  ;;  %v351_v29 = vsub.f32 %v349_v33, %v350_v44 }
  0xb0   :  { %v229_v49 = vsel %vm206_vm4, %v203_v47, 0 }
  0xb1   :  { %v368_v50 = vand.u32 4294901760, %v229_v49  ;;  %v352_v51 = vand.u32 4294901760, %v351_v29  ;;  %v360_v53 = vand.u32 4294901760, %v359_v46 }
  0xb3   :  { %v369_v55 = vsub.f32 %v229_v49, %v368_v50  ;;  %1076 = vmatmul.mubr.f32.gmra.mrb[4].mxu1 %v352_v51  ;;  %1126 = vmatprep.mubr.f32.mxu0 %v360_v53  ;;  %v361_v56 = vsub.f32 %v359_v46, %v360_v53 }
  0xb5   :  { %v362_v58 = vand.u32 4294901760, %v361_v56  ;;  %v370_v59 = vand.u32 4294901760, %v369_v55 }
  0xb7   :  { %1078 = vmatprep.mubr.f32.mxu1 %v362_v58  ;;  %1127 = vmatmul.mubr.f32.gmra.mrb[6].mxu0 %v370_v59  ;;  %v371_v60 = vsub.f32 %v369_v55, %v370_v59 }
  0xb8   :  { %1133 = vmatprep.mubr.f32.mxu0 %v1392_v35 }
  0xb9   :  { %v372_v61 = vand.u32 4294901760, %v371_v60 }
  0xbb   :  { %1079 = vmatmul.mubr.f32.gmra.mrb[6].mxu1 %v372_v61  ;;  %1134 = vmatmul.mubr.f32.vlgmr.msra.gmra.mrb[0].mxu0 %v1384_v28 }
  0xbc   :  { %1085 = vmatprep.mubr.f32.mxu1 %v1392_v35  ;;  %1136 = vmatprep.mubr.f32.mxu0 %v1403_v48 }
  0xbd   :  { %1184 = vmatpush3.bf16.msra.mxu0 %v1319_v37 }
  0xbf   :  { %1086 = vmatmul.mubr.f32.vlgmr.msra.gmra.mrb[0].mxu1 %v1384_v28  ;;  %1137 = vmatmul.mubr.f32.gmra.mrb[2].mxu0 %v1416_v63 }
  0xc0   :  { %1172 = vmatpush3.bf16.msra.mxu1 %v1372_v7  ;;  %1088 = vmatprep.mubr.f32.mxu1 %v1403_v48 }
  0xc1   :  { %1139 = vmatprep.mubr.f32.mxu0 %v1430_v14 }
  0xc3   :  { %1089 = vmatmul.mubr.f32.gmra.mrb[2].mxu1 %v1416_v63  ;;  %1140 = vmatmul.mubr.f32.gmra.mrb[4].mxu0 %v1444_v6 }
  0xc4   :  { %1091 = vmatprep.mubr.f32.mxu1 %v1430_v14  ;;  %1142 = vmatprep.mubr.f32.mxu0 %v358_v41 }
  0xc7   :  { %1092 = vmatmul.mubr.f32.gmra.mrb[4].mxu1 %v1444_v6  ;;  %1143 = vmatmul.mubr.f32.gmra.mrb[6].mxu0 %v368_v50 }
  0xc8   :  { %1094 = vmatprep.mubr.f32.mxu1 %v358_v41  ;;  %1149 = vmatprep.mubr.f32.mxu0 %v1392_v35 }
  0xcb   :  { %1095 = vmatmul.mubr.f32.gmra.mrb[6].mxu1 %v368_v50  ;;  %1150 = vmatmul.mubr.f32.vlgmr.msra.gmra.mrb[0].mxu0 %v1384_v28 }
  0xcc   :  { %1101 = vmatprep.mubr.f32.mxu1 %v1398_v43  ;;  %1152 = vmatprep.mubr.f32.mxu0 %v1403_v48 }
  0xcf   :  { %1102 = vmatmul.mubr.f32.vlgmr.msra.gmra.mrb[0].mxu1 %v1390_v34  ;;  %1153 = vmatmul.mubr.f32.gmra.mrb[2].mxu0 %v1416_v63 }
  0xd0   :  { %1104 = vmatprep.mubr.f32.mxu1 %v1410_v54  ;;  %1155 = vmatprep.mubr.f32.mxu0 %v1430_v14 }
  0xd3   :  { %1105 = vmatmul.mubr.f32.gmra.mrb[2].mxu1 %v1424_v8  ;;  %1156 = vmatmul.mubr.f32.gmra.mrb[4].mxu0 %v1444_v6 }
  0xd4   :  { %1107 = vmatprep.mubr.f32.mxu1 %v1438_v21  ;;  %1158 = vmatprep.mubr.f32.mxu0 %v358_v41 }
  0xd7   :  { %1108 = vmatmul.mubr.f32.gmra.mrb[4].mxu1 %v349_v33  ;;  %1159 = vmatmul.mubr.f32.gmra.mrb[6].mxu0 %v368_v50 }
  0xd8   :  { %1110 = vmatprep.mubr.f32.mxu1 %v359_v46 }
  0xdb   :  { %1111 = vmatmul.mubr.f32.gmra.mrb[6].mxu1 %v369_v55 }
 0x19e   :  { %v1151_v37 = vpop.f32.mrb[0].mxu0 }
 0x19f   :  { %v945_v7 = vpop.f32.mrb[1].mxu0 }
 0x1a2   :  { %v1103_v28 = vpop.f32.mrb[0].mxu1  ;;  %v1154_v34 = vpop.f32.mrb[2].mxu0 }
 0x1a3   :  { %v1185_v35 = vadd.f32 %v1151_v37, %v1103_v28  ;;  %v573_v43 = vpop.f32.mrb[1].mxu1  ;;  %v957_v48 = vpop.f32.mrb[3].mxu0 }
 0x1a4   :  { %v1186_v54 = vadd.f32 %v945_v7, %v573_v43 }
 0x1a5   :  { %993 = vst.msk [vmem:[%s1515_s2 + $0x8] sm:$0x3f] %vm991_vm5, %v1185_v35 }
 0x1a6   :  { %992 = vst.msk [vmem:[%s1515_s2] sm:$0x3f] %vm991_vm5, %v1186_v54  ;;  %v1106_v38 = vpop.f32.mrb[2].mxu1  ;;  %v1157_v62 = vpop.f32.mrb[4].mxu0 }
 0x1a7   :  { %v1187_v63 = vadd.f32 %v1154_v34, %v1106_v38  ;;  %v587_v0 = vpop.f32.mrb[3].mxu1  ;;  %v969_v1 = vpop.f32.mrb[5].mxu0 }
 0x1a8   :  { %v1188_v2 = vadd.f32 %v957_v48, %v587_v0 }
 0x1a9   :  { %995 = vst.msk [vmem:[%s1515_s2 + $0x18] sm:$0x3f] %vm991_vm5, %v1187_v63 }
 0x1aa   :  { %994 = vst.msk [vmem:[%s1515_s2 + $0x10] sm:$0x3f] %vm991_vm5, %v1188_v2  ;;  %v1109_v4 = vpop.f32.mrb[4].mxu1  ;;  %v1160_v5 = vpop.f32.mrb[6].mxu0 }
 0x1ab   :  { %v1189_v8 = vadd.f32 %v1157_v62, %v1109_v4  ;;  %v601_v9 = vpop.f32.mrb[5].mxu1  ;;  %v981_v10 = vpop.f32.mrb[7].mxu0 }
 0x1ac   :  { %v1190_v12 = vadd.f32 %v969_v1, %v601_v9 }
 0x1ad   :  { %997 = vst.msk [vmem:[%s1515_s2 + $0x28] sm:$0x3f] %vm991_vm5, %v1189_v8 }
 0x1ae   :  { %996 = vst.msk [vmem:[%s1515_s2 + $0x20] sm:$0x3f] %vm991_vm5, %v1190_v12  ;;  %v1112_v45 = vpop.f32.mrb[6].mxu1 }
 0x1af   :  { %v1191_v13 = vadd.f32 %v1160_v5, %v1112_v45  ;;  %v615_v3 = vpop.f32.mrb[7].mxu1 }
 0x1b0   :  { %v1192_v14 = vadd.f32 %v981_v10, %v615_v3 }
 0x1b1   :  { %999 = vst.msk [vmem:[%s1515_s2 + $0x38] sm:$0x3f] %vm991_vm5, %v1191_v13 }
 0x1b2   :  { %998 = vst.msk [vmem:[%s1515_s2 + $0x30] sm:$0x3f] %vm991_vm5, %v1192_v14 }
 0x1b3   :  { %1004 = vsyncpa [#allocation3], 1 }

</bundles_post_ra>
